<compile_context>
chip_gen: v7x
topology: tpu7x:2x2x1
jax: 0.10.0
libtpu: 0.0.40
codegen_flags: <defaults>
</compile_context>

<pallas_src>
import functools

import jax
import jax.numpy as jnp
from jax.experimental import pallas as pl
from jax.experimental.pallas import tpu as pltpu


def _tile_budget_bytes() -> int:
    """Double-buffer budget (2 input bufs + 2 output bufs) for one pallas_call."""
    try:
        info = pltpu.get_tpu_info()
        vmem = getattr(info, "vmem_capacity_bytes", 64 << 20)
    except Exception:  # conservative fallback if HW query is unavailable
        vmem = 64 << 20
    # v5e/v6e (128 MiB VMEM): allow 2x bigger tiles than v7x (64 MiB).
    # Both budgets stay well under the explicit vmem_limit_bytes set below.
    return (16 << 20) if vmem >= (128 << 20) else (8 << 20)


def _choose_rows_tile(rows: int, L: int, out_L: int, itemsize: int) -> int:
    # Sublane packing: 8 rows for 4-byte dtypes, 16 for bf16/fp16, 32 for int8.
    mult = max(8, 32 // itemsize)
    if rows <= mult:
        return rows  # full-extent block is always layout-legal
    bytes_per_row = 2 * (L + out_L) * itemsize  # double-buffered in + out
    tile = max(mult, (_tile_budget_bytes() // bytes_per_row) // mult * mult)
    tile = min(tile, ((rows + mult - 1) // mult) * mult)
    return tile


def _wrap_ref(x, w):
    """Pure-JAX reference (also used as the tiny-input fallback)."""
    return jnp.concatenate([x[..., -w:], x, x[..., :w]], axis=-1)


@functools.partial(
    jax.jit, static_argnames=("wrap_size", "rows_tile", "min_pallas_bytes")
)
def wrap1d(x, *, wrap_size=1, rows_tile=None, min_pallas_bytes=(32 << 10)):
    """Pallas implementation of Wrap1d.forward for a (N, C, L) input."""
    N, C, L = x.shape
    w = int(wrap_size)
    assert 0 < w <= L, "wrap_size must be in (0, L]"
    out_L = L + 2 * w
    itemsize = jnp.dtype(x.dtype).itemsize

    # Tiny inputs: kernel launch + grid overhead >> copy time; let XLA fuse it.
    if x.size * itemsize < min_pallas_bytes:
        return _wrap_ref(x, w)

    rows = N * C
    x2 = x.reshape(rows, L)  # collapse (N, C) -> rows (metadata-only reshape)
    tile = (
        int(rows_tile)
        if rows_tile is not None
        else _choose_rows_tile(rows, L, out_L, itemsize)
    )

    def kernel(x_ref, o_ref):
        xv = x_ref[...]  # (tile, L) tile in VMEM
        # Single full-width (lane-dense) store; wrap assembled in vregs (XLU),
        # instead of three masked vst.msk partial stores.
        o_ref[...] = jnp.concatenate([xv[:, L - w:], xv, xv[:, :w]], axis=-1)

    out2 = pl.pallas_call(
        kernel,
        out_shape=jax.ShapeDtypeStruct((rows, out_L), x.dtype),
        grid=(pl.cdiv(rows, tile),),
        in_specs=[pl.BlockSpec((tile, L), lambda i: (i, 0))],
        out_specs=pl.BlockSpec((tile, out_L), lambda i: (i, 0)),
        compiler_params=pltpu.CompilerParams(
            dimension_semantics=("parallel",),  # megacore sharding on v7x
            vmem_limit_bytes=32 << 20,          # explicit, safe on v5e/v6e/v7x
        ),
    )(x2)
    return out2.reshape(N, C, out_L)


if __name__ == "__main__":
    key = jax.random.PRNGKey(0)
    k1, k2, k3 = jax.random.split(key, 3)

    # 1) Small f32 input, forced through the Pallas path (single grid step).
    x1 = jax.random.normal(k1, (2, 4, 16), dtype=jnp.float32)
    o1 = jax.block_until_ready(wrap1d(x1, wrap_size=1, min_pallas_bytes=0))
    assert o1.shape == (2, 4, 18) and o1.dtype == x1.dtype
    assert jnp.array_equal(o1, _wrap_ref(x1, 1)), "mismatch (case 1)"

    # 2) Multi-step parallel row grid (rows=24, rows_tile=8 -> 3 steps), w=3.
    x2 = jax.random.normal(k2, (3, 8, 64), dtype=jnp.float32)
    o2 = jax.block_until_ready(
        wrap1d(x2, wrap_size=3, rows_tile=8, min_pallas_bytes=0)
    )
    assert o2.shape == (3, 8, 70)
    assert jnp.array_equal(o2, _wrap_ref(x2, 3)), "mismatch (case 2)"

    # 3) bf16 input (sublane packing of 16 rows), w=2.
    x3 = jax.random.normal(k3, (2, 16, 128), dtype=jnp.bfloat16)
    o3 = jax.block_until_ready(wrap1d(x3, wrap_size=2, min_pallas_bytes=0))
    assert o3.shape == (2, 16, 132) and o3.dtype == jnp.bfloat16
    assert jnp.array_equal(o3, _wrap_ref(x3, 2)), "mismatch (case 3)"

    # 4) Tiny-input fallback path (default threshold -> no Pallas launch).
    o4 = jax.block_until_ready(wrap1d(x1, wrap_size=1))
    assert jnp.array_equal(o4, _wrap_ref(x1, 1)), "mismatch (case 4)"

    print("KERNEL_OK")
</pallas_src>

<mosaic_0001>
module attributes {stable_mosaic.version = 11 : i64} {
  func.func @kernel(%arg0: i32, %arg1: memref<8x16xf32, #tpu.memory_space<vmem>>, %arg2: memref<8x18xf32, #tpu.memory_space<vmem>>) attributes {dimension_semantics = [#tpu.dimension_semantics<parallel>], iteration_bounds = array<i64: 1>, scalar_prefetch = 0 : i64, scratch_operands = 0 : i64, tpu.core_type = #tpu.core_type<tc>, window_params = [{transform_indices = @transform_0, window_bounds = array<i64: 8, 16>}, {transform_indices = @transform_1, window_bounds = array<i64: 8, 18>}]} {
    %c0 = arith.constant 0 : index
    %c0_0 = arith.constant 0 : index
    %0 = vector.load %arg1[%c0, %c0_0] : memref<8x16xf32, #tpu.memory_space<vmem>>, vector<8x16xf32>
    %1 = vector.extract_strided_slice %0 {offsets = [0, 15], sizes = [8, 1], strides = [1, 1]} : vector<8x16xf32> to vector<8x1xf32>
    %2 = vector.extract_strided_slice %0 {offsets = [0, 0], sizes = [8, 1], strides = [1, 1]} : vector<8x16xf32> to vector<8x1xf32>
    %3 = tpu.concatenate %1, %0, %2 in 1 : vector<8x1xf32>, vector<8x16xf32>, vector<8x1xf32> -> vector<8x18xf32>
    %c0_1 = arith.constant 0 : index
    %c0_2 = arith.constant 0 : index
    %4 = vector.load %arg2[%c0_1, %c0_2] : memref<8x18xf32, #tpu.memory_space<vmem>>, vector<8x18xf32>
    tpu.vector_store %arg2[%c0_1, %c0_2], %3 {strides = array<i32>} : memref<8x18xf32, #tpu.memory_space<vmem>>, vector<8x18xf32>,
    return
  }
  func.func @transform_0(%arg0: i32) -> (i32, i32) {
    %c0_i32 = arith.constant 0 : i32
    %c0_i32_0 = arith.constant 0 : i32
    return %arg0, %c0_i32 : i32, i32
  }
  func.func @transform_1(%arg0: i32) -> (i32, i32) {
    %c0_i32 = arith.constant 0 : i32
    %c0_i32_0 = arith.constant 0 : i32
    return %arg0, %c0_i32 : i32, i32
  }
}

</mosaic_0001>

<bundles_post_ra>
// kernel: wrap1d.1
= control target key start
LH: loop header
LB: loop body
LE: loop exit
PB: predicated region body
PF: predicated region fallthrough
CT: control target
= control target key end

     0   :  { %6 = vsyncpa [#allocation3], 0  ;;  %s145_s0 = inlined_call_operand.hbm [shape: f32[8,16], index: 0, kind: input, shape index: {}]   ;;  %s146_s1 = inlined_call_operand.hbm [shape: f32[8,18], index: 1, kind: output, shape index: {}]  }
   0x1   :  { %7 = vsyncpa [#allocation4], 0  ;;  %s106_s6 = smov [#allocation2]   ;;  %s58_s10 = scalar_lea.hbm %s145_s0, 128 }
   0x2   :  { %s14_s7 = sshll.u32 %s106_s6, 4  ;;  %p59_p0 = scmp.ne.s32.totalorder %s145_s0, %s58_s10  ;;  %s15_s7 = int_to_ptr.vmem [resolvable:$true] %s14_s7 }
   0x3   :  { %p62_p1 = scmp.lt.u32.totalorder %s58_s10, %s145_s0 }
   0x5   :  { %p64_p2 = pnand %p62_p1, %p59_p0 }
   0x7   :  { %67 = shalt.err (!%p64_p2)
}
   0x8   :  { %s68_s15 = scalar_lea.vmem %s15_s7, 128  ;;  %p73_p4 = scmp.lt.s32.totalorder %s15_s7, %s15_s7 }
   0x9   :  { %p69_p3 = scmp.ne.s32.totalorder %s15_s7, %s68_s15  ;;  %p74_p5 = scmp.lt.s32.totalorder %s68_s15, %s68_s15 }
   0xb   :  { %p75_p6 = por %p74_p5, %p73_p4 }
   0xd   :  { %p76_p7 = pnand %p75_p6, %p69_p3 }
   0xf   :  { %79 = shalt.err (!%p76_p7)
}
  0x10   :  { %17 = dma.hbm_to_vmem [thread:$0]  %s145_s0, 128, %s15_s7, [#allocation3]  }
  0x11   :  { %102 = dma.done.wait [#allocation3], 128  }
  0x12   :  { %103 = vsyncadd [#allocation3], 4294967168  ;;  %v21_v0 = vld [vmem:[#allocation2] sm:$0xff]  ;;  %s107_s18 = smov 113   ;;  %s108_s19 = smov 17   ;;  %vm32_vm0 = vcmask 7168  }
  0x13   :  { %23 = vrot.lane.b32.xlu0 %v21_v0, %s107_s18  ;;  %29 = vrot.lane.b32.xlu1 %v21_v0, %s108_s19  ;;  %s109_s20 = smov 1   ;;  %s110_s21 = smov [#allocation5]   ;;  %vm34_vm1 = vcmask 138240   ;;  %vm36_vm2 = vcmask 146432  }
  0x14   :  { %s44_s22 = sshll.u32 %s110_s21, 4  ;;  %s45_s22 = int_to_ptr.vmem [resolvable:$true] %s44_s22 }
  0x15   :  { %s80_s0 = scalar_lea.vmem %s45_s22, 128  ;;  %p85_p9 = scmp.lt.s32.totalorder %s45_s22, %s45_s22 }
  0x16   :  { %p81_p8 = scmp.ne.s32.totalorder %s45_s22, %s80_s0  ;;  %p86_p10 = scmp.lt.s32.totalorder %s80_s0, %s80_s0 }
  0x17   :  { %26 = vrot.lane.b32.xlu0 %v21_v0, %s109_s20 }
  0x18   :  { %p87_p11 = por %p86_p10, %p85_p9 }
  0x1a   :  { %p88_p12 = pnand %p87_p11, %p81_p8 }
  0x85   :  { %v24_v1 = vpop.permute.xlu0 %23  ;;  %v30_v2 = vpop.permute.xlu1 %29 }
  0x89   :  { %v27_v3 = vpop.permute.xlu0 %26 }
  0x8a   :  { %v33_v4 = vsel %vm32_vm0, %v24_v1, %v27_v3 }
  0x8b   :  { %v35_v5 = vsel %vm34_vm1, %v33_v4, %v30_v2 }
  0x8c   :  { %37 = vst.msk [vmem:[#allocation5] sm:$0xff] %vm36_vm2, %v35_v5 }
  0x8d   :  { %91 = shalt.err (!%p88_p12)
}
  0x8e   :  { %s92_s25 = scalar_lea.hbm %s146_s1, 128 }
  0x8f   :  { %p93_p13 = scmp.ne.s32.totalorder %s146_s1, %s92_s25  ;;  %p96_p0 = scmp.lt.u32.totalorder %s92_s25, %s146_s1 }
  0x91   :  { %p98_p1 = pnand %p96_p0, %p93_p13 }
  0x93   :  { %101 = shalt.err (!%p98_p1)
}
  0x94   :  { %47 = dma.vmem_to_hbm [thread:$0]  %s45_s22, 128, %s146_s1, [#allocation4]  }
  0x95   :  { %104 = dma.done.wait [#allocation4], 128  }
  0x96   :  { %105 = vsyncadd [#allocation4], 4294967168 }
  0x97   :  { %51 = vsyncpa [#allocation3], 1 }
  0x98   :  { %52 = vsyncpa [#allocation4], 1 }

</bundles_post_ra>
